<compile_context>
chip_gen: v7x
topology: tpu7x:2x2x1
jax: 0.10.0
libtpu: 0.0.40
codegen_flags: <defaults>
</compile_context>

<pallas_src>
import functools

import jax
import jax.numpy as jnp
from jax.experimental import pallas as pl
from jax.experimental.pallas import tpu as pltpu


# ----------------------------- config / tiling helpers -----------------------------

@functools.lru_cache(maxsize=None)
def _vmem_limit_bytes():
    """~75% of this generation's physical VMEM (96 MiB v5e/v6e, 48 MiB v7x)."""
    try:
        return int(pltpu.get_tpu_info().vmem_capacity_bytes * 3 // 4)
    except Exception:  # pragma: no cover - conservative fallback, safe on every chip
        return 48 * 1024 * 1024


def _pick_tile(dim, preferred, align):
    """Full extent if small; otherwise an aligned tile (partial trailing block is OK)."""
    if dim <= preferred:
        return dim
    t = (preferred // align) * align
    return max(t, align)


def _pick_k_tile(K, preferred=512):
    """Contraction tile must divide K exactly (OOB reads would corrupt the accumulator)."""
    if K <= preferred:
        return K
    for cand in (preferred, 256, 128):
        if K % cand == 0:
            return cand
    return K


def _pick_seq_tile(dim, preferred, align):
    """Largest multiple of `align` <= preferred that divides `dim` exactly (no partial
    KV blocks -> no out-of-bounds keys entering the softmax); falls back to full."""
    if dim <= preferred:
        return dim
    t = (min(preferred, dim) // align) * align
    while t >= align:
        if dim % t == 0:
            return t
        t -= align
    return dim


# ----------------------------- tiled Linear kernel (fused QKV projection) -----------------------------

def _linear_bias_kernel(x_ref, w_ref, b_ref, o_ref, acc_ref):
    @pl.when(pl.program_id(2) == 0)
    def _init():
        acc_ref[...] = jnp.zeros_like(acc_ref)

    # Native-dtype MXU operands, f32 accumulation.
    acc_ref[...] += jnp.dot(x_ref[...], w_ref[...], preferred_element_type=jnp.float32)

    @pl.when(pl.program_id(2) == pl.num_programs(2) - 1)
    def _finalize():
        o_ref[...] = (acc_ref[...] + b_ref[...].astype(jnp.float32)).astype(o_ref.dtype)


def linear(x2d, w, b, *, tm=256, tn=512, tk=512):
    """x2d: (M, K); w: (K, N) (already transposed vs. torch's (N, K)); b: (N,)."""
    M, K = x2d.shape
    N = w.shape[1]
    tm = _pick_tile(M, tm, 8)
    tn = _pick_tile(N, tn, 128)
    tk = _pick_k_tile(K, tk)
    grid = (pl.cdiv(M, tm), pl.cdiv(N, tn), K // tk)
    return pl.pallas_call(
        _linear_bias_kernel,
        out_shape=jax.ShapeDtypeStruct((M, N), x2d.dtype),
        grid=grid,
        in_specs=[
            pl.BlockSpec((tm, tk), lambda i, j, k: (i, k)),
            pl.BlockSpec((tk, tn), lambda i, j, k: (k, j)),
            pl.BlockSpec((1, tn), lambda i, j, k: (0, j)),
        ],
        out_specs=pl.BlockSpec((tm, tn), lambda i, j, k: (i, j)),
        scratch_shapes=[pltpu.VMEM((tm, tn), jnp.float32)],
        compiler_params=pltpu.CompilerParams(
            dimension_semantics=("parallel", "parallel", "arbitrary"),
            vmem_limit_bytes=_vmem_limit_bytes()),
    )(x2d, w, b.reshape(1, N))


# ----------------------------- fused MLP kernel -----------------------------

def _mlp_fused_kernel(x_ref, w1_ref, b1_ref, w2_ref, b2_ref, w3_ref, b3_ref,
                      w4_ref, b4_ref, o_ref):
    x = x_ref[...]                 # native dtype (bf16 stays bf16 on the MXU)
    cdt = x.dtype

    def dense(h, w_ref, b_ref, act):
        y = jnp.dot(h, w_ref[...], preferred_element_type=jnp.float32)
        y = y + b_ref[...].astype(jnp.float32)
        if act:
            # TODO(synk): tanh GELU vs torch's exact erf (~1e-3 relative).
            y = jax.nn.gelu(y, approximate=True)
        return y

    h = dense(x, w1_ref, b1_ref, True).astype(cdt)
    h = dense(h, w2_ref, b2_ref, True).astype(cdt)
    h = dense(h, w3_ref, b3_ref, True).astype(cdt)
    y = dense(h, w4_ref, b4_ref, False)
    # MLP-internal residual (+x) fused with the outer `x_out + mlp(x_out)` (+x) => +2x.
    o_ref[...] = (y + 2.0 * x.astype(jnp.float32)).astype(o_ref.dtype)


def mlp_fused(x2d, hidden_params, out_params, *, tm=256):
    M, C = x2d.shape
    (w1, b1), (w2, b2), (w3, b3) = hidden_params
    w4, b4 = out_params
    assert w4.shape[1] == C, "residual folding requires MLP output dim == input dim"
    tm = _pick_tile(M, tm, 8)
    grid = (pl.cdiv(M, tm),)

    # Weights / biases fully resident in VMEM (constant index_map -> no re-DMA per step).
    # TODO(synk): single-buffer these (pl.Buffered(1)) or tile hidden dim for large C (v7x).
    def full_spec(a):
        return pl.BlockSpec(a.shape, lambda i: (0,) * a.ndim)

    args = [x2d,
            w1, b1.reshape(1, -1), w2, b2.reshape(1, -1),
            w3, b3.reshape(1, -1), w4, b4.reshape(1, -1)]
    in_specs = [pl.BlockSpec((tm, C), lambda i: (i, 0))] + [full_spec(a) for a in args[1:]]
    return pl.pallas_call(
        _mlp_fused_kernel,
        out_shape=jax.ShapeDtypeStruct((M, C), x2d.dtype),
        grid=grid,
        in_specs=in_specs,
        out_specs=pl.BlockSpec((tm, C), lambda i: (i, 0)),
        compiler_params=pltpu.CompilerParams(
            dimension_semantics=("parallel",),
            vmem_limit_bytes=_vmem_limit_bytes()),
    )(*args)


# ----------------------------- attention kernels -----------------------------

def _attn_masked_kernel(q_ref, k_ref, v_ref, bias_ref, o_ref,
                        m_scr, l_scr, acc_scr, *, scale, num_heads, head_dim):
    """Flash-style online-softmax attention over KV blocks, all heads per program.

    Blocks are lane-dense (seq, C): heads live along lanes and are split with static
    lane slices (no in-kernel relayout, no lane concat, no D<128 lane-padded DMA).
    """
    kv_i = pl.program_id(2)

    @pl.when(kv_i == 0)
    def _init():
        m_scr[...] = jnp.full_like(m_scr, -jnp.inf)
        l_scr[...] = jnp.zeros_like(l_scr)
        acc_scr[...] = jnp.zeros_like(acc_scr)

    q = q_ref[0]                       # (tq,  C)  native dtype
    k = k_ref[0]                       # (tkv, C)
    v = v_ref[0]                       # (tkv, C)
    bias = bias_ref[0]                 # (1, tkv)  f32 additive key mask (0 / -inf)

    for h in range(num_heads):
        sl = slice(h * head_dim, (h + 1) * head_dim)
        # Native-dtype MXU matmul, f32 accumulation; scale applied to the f32 scores.
        s = jax.lax.dot_general(q[:, sl], k[:, sl],
                                (((1,), (1,)), ((), ())),
                                preferred_element_type=jnp.float32)        # (tq, tkv)
        s = s * scale + bias
        m_prev = m_scr[:, h:h + 1]                                         # (tq, 1)
        m_new = jnp.maximum(m_prev, jnp.max(s, axis=-1, keepdims=True))
        # Guard fully-masked rows (m == -inf): probabilities become exact zeros
        # (cheaper / more robust than the previous full-tile isnan fixup).
        m_safe = jnp.where(m_new == -jnp.inf, 0.0, m_new)
        alpha = jnp.exp(m_prev - m_safe)                                   # (tq, 1)
        p = jnp.exp(s - m_safe)                                            # (tq, tkv)
        l_scr[:, h:h + 1] = alpha * l_scr[:, h:h + 1] + jnp.sum(p, axis=-1, keepdims=True)
        pv = jnp.dot(p.astype(v.dtype), v[:, sl],
                     preferred_element_type=jnp.float32)                   # (tq, D)
        acc_scr[:, sl] = alpha * acc_scr[:, sl] + pv
        m_scr[:, h:h + 1] = m_new

    @pl.when(kv_i == pl.num_programs(2) - 1)
    def _finalize():
        for h in range(num_heads):
            sl = slice(h * head_dim, (h + 1) * head_dim)
            l = l_scr[:, h:h + 1]
            l_safe = jnp.where(l == 0.0, 1.0, l)   # fully-masked rows -> 0 (torch NaN->0)
            acc_scr[:, sl] = acc_scr[:, sl] * pl.reciprocal(l_safe, approx=False)
        o_ref[0] = acc_scr[...].astype(o_ref.dtype)  # single lane-dense (tq, C) store


def _attn_nomask_kernel(q_ref, k_ref, v_ref, o_ref, acc_scr,
                        *, scale, num_heads, head_dim):
    """mask=None reproduces the PyTorch quirk: raw (scaled) scores @ v, NO softmax."""
    kv_i = pl.program_id(2)

    @pl.when(kv_i == 0)
    def _init():
        acc_scr[...] = jnp.zeros_like(acc_scr)

    q = q_ref[0]
    k = k_ref[0]
    v = v_ref[0]
    for h in range(num_heads):
        sl = slice(h * head_dim, (h + 1) * head_dim)
        s = jax.lax.dot_general(q[:, sl], k[:, sl],
                                (((1,), (1,)), ((), ())),
                                preferred_element_type=jnp.float32) * scale
        acc_scr[:, sl] += jnp.dot(s.astype(v.dtype), v[:, sl],
                                  preferred_element_type=jnp.float32)

    @pl.when(kv_i == pl.num_programs(2) - 1)
    def _finalize():
        o_ref[0] = acc_scr[...].astype(o_ref.dtype)


def multihead_attention(qkv, bias, scale, num_heads, *, q_block=256, kv_block=512):
    """qkv: (B, S, 3C) fused projection output (columns = [q | k | v]).
    bias: (B, 1, S) f32 additive key mask (0 / -inf) or None.
    Returns (B, S, C) with heads already concatenated along channels (lane-dense)."""
    B, S, C3 = qkv.shape
    C = C3 // 3
    assert C % num_heads == 0
    D = C // num_heads
    tq = _pick_seq_tile(S, q_block, 8)
    tkv = _pick_seq_tile(S, kv_block, 128)   # multiple of 128 (or full S) -> bias block legal
    nq = S // tq
    nkv = S // tkv

    if C % 128 == 0:
        # Fused-qkv path: column-block index_maps select q / k / v (no XLA split pass).
        q_spec = pl.BlockSpec((1, tq, C), lambda b, i, j: (b, i, 0))
        k_spec = pl.BlockSpec((1, tkv, C), lambda b, i, j: (b, j, 1))
        v_spec = pl.BlockSpec((1, tkv, C), lambda b, i, j: (b, j, 2))
        q_in = k_in = v_in = qkv
    else:
        # TODO(synk): fallback for lane-unaligned C splits q/k/v in XLA (extra HBM pass).
        q_in, k_in, v_in = jnp.split(qkv, 3, axis=-1)
        q_spec = pl.BlockSpec((1, tq, C), lambda b, i, j: (b, i, 0))
        k_spec = pl.BlockSpec((1, tkv, C), lambda b, i, j: (b, j, 0))
        v_spec = pl.BlockSpec((1, tkv, C), lambda b, i, j: (b, j, 0))

    out_spec = pl.BlockSpec((1, tq, C), lambda b, i, j: (b, i, 0))
    out_shape = jax.ShapeDtypeStruct((B, S, C), qkv.dtype)
    cp = pltpu.CompilerParams(
        dimension_semantics=("parallel", "parallel", "arbitrary"),
        vmem_limit_bytes=_vmem_limit_bytes())

    if bias is None:
        kern = functools.partial(_attn_nomask_kernel, scale=scale,
                                 num_heads=num_heads, head_dim=D)
        return pl.pallas_call(
            kern, out_shape=out_shape, grid=(B, nq, nkv),
            in_specs=[q_spec, k_spec, v_spec], out_specs=out_spec,
            scratch_shapes=[pltpu.VMEM((tq, C), jnp.float32)],
            compiler_params=cp,
        )(q_in, k_in, v_in)

    bias_spec = pl.BlockSpec((1, 1, tkv), lambda b, i, j: (b, 0, j))
    kern = functools.partial(_attn_masked_kernel, scale=scale,
                             num_heads=num_heads, head_dim=D)
    return pl.pallas_call(
        kern, out_shape=out_shape, grid=(B, nq, nkv),
        in_specs=[q_spec, k_spec, v_spec, bias_spec], out_specs=out_spec,
        scratch_shapes=[pltpu.VMEM((tq, num_heads), jnp.float32),   # running max  m
                        pltpu.VMEM((tq, num_heads), jnp.float32),   # running sum  l
                        pltpu.VMEM((tq, C), jnp.float32)],          # output accumulator
        compiler_params=cp,
    )(q_in, k_in, v_in, bias)


# ----------------------------- parameter init -----------------------------

def init_linear(key, in_f, out_f):
    kw, kb = jax.random.split(key)
    bound = 1.0 / (in_f ** 0.5)  # torch nn.Linear default init
    w = jax.random.uniform(kw, (in_f, out_f), jnp.float32, -bound, bound)  # stored (in, out)
    b = jax.random.uniform(kb, (out_f,), jnp.float32, -bound, bound)
    return w, b


def init_attention_params(key, dim, mlp_ratio=1.0):
    mlp_hidden = int(dim * mlp_ratio)
    # MLP layer dims (num_layers=4): [dim, d1, d2, hidden, hidden] (all == dim when ratio=1).
    step = (mlp_hidden - dim) / 3.0
    dims = [dim] + [int(dim + i * step) for i in (1, 2, 3)]
    dims.append(dims[-1])
    keys = jax.random.split(key, 7)
    wq, bq = init_linear(keys[0], dim, dim)
    wk, bk = init_linear(keys[1], dim, dim)
    wv, bv = init_linear(keys[2], dim, dim)
    return {
        # fused QKV projection: (C, 3C) weight, (3C,) bias, column blocks = [q | k | v]
        "qkv": (jnp.concatenate([wq, wk, wv], axis=1),
                jnp.concatenate([bq, bk, bv], axis=0)),
        "mlp_hidden": [init_linear(keys[3], dims[0], dims[1]),
                       init_linear(keys[4], dims[1], dims[2]),
                       init_linear(keys[5], dims[2], dims[3])],
        "mlp_out": init_linear(keys[6], dims[3], dims[4]),
    }


# ----------------------------- forward pass -----------------------------

def attention_forward(params, x, mask_modality, mask=None, num_heads=8,
                      q_block=256, kv_block=512):
    B, S, C = x.shape
    D = C // num_heads
    scale = D ** (-0.5)

    # Fused Q/K/V projection: one tiled matmul (B*S, C) @ (C, 3C).
    x2d = x.reshape(B * S, C)
    qkv = linear(x2d, *params["qkv"]).reshape(B, S, 3 * C)

    if mask is not None:
        start = {"a": 0, "t": 1, "v": 2}[mask_modality] * S
        keep = mask[:, start:start + S].astype(bool)
        bias = jnp.where(keep, 0.0, -jnp.inf).astype(jnp.float32).reshape(B, 1, S)
    else:
        bias = None

    # Attention consumes the fused qkv directly (column-block BlockSpecs) and emits
    # (B, S, C) lane-dense output: no split / head-transpose passes through HBM.
    x_out = multihead_attention(qkv, bias, scale, num_heads,
                                q_block=q_block, kv_block=kv_block)

    # Fused MLP (3x Linear+GELU -> fc_out) with both residual adds folded:
    #   x_out + mlp(x_out) = fc_out(chain(x_out)) + 2 * x_out
    out2d = mlp_fused(x_out.reshape(B * S, C), params["mlp_hidden"], params["mlp_out"])
    return out2d.reshape(B, S, C)


# ----------------------------- pure-JAX reference (mirrors the PyTorch module) -----------------------------

def attention_reference(params, x, mask_modality, mask=None, num_heads=8):
    B, S, C = x.shape
    D = C // num_heads
    scale = D ** (-0.5)
    with jax.default_matmul_precision("highest"):
        wqkv, bqkv = params["qkv"]
        qkv = x.reshape(B * S, C) @ wqkv + bqkv
        q, k, v = jnp.split(qkv.reshape(B, S, 3 * C), 3, axis=-1)

        def heads(t):
            return t.reshape(B, S, num_heads, D).transpose(0, 2, 1, 3)

        q, k, v = heads(q), heads(k), heads(v)
        q = q * scale
        attn = jnp.einsum("bhqd,bhkd->bhqk",
                          q.astype(jnp.float32), k.astype(jnp.float32))
        if mask is not None:
            start = {"a": 0, "t": 1, "v": 2}[mask_modality] * S
            keep = mask[:, start:start + S].astype(bool)[:, None, None, :]
            attn = jnp.where(keep, attn, -jnp.inf)
            m = jnp.max(attn, axis=-1, keepdims=True)
            e = jnp.exp(attn - m)
            attn = (e / jnp.sum(e, axis=-1, keepdims=True)).astype(x.dtype)
            attn = jnp.where(jnp.isnan(attn), 0.0, attn)
        x_out = jnp.einsum("bhqk,bhkd->bhqd", attn, v.astype(attn.dtype))
        x_out = x_out.transpose(0, 2, 1, 3).reshape(B, S, C).astype(x.dtype)

        h = x_out.reshape(B * S, C)
        identity = h
        for w, b in params["mlp_hidden"]:
            h = jax.nn.gelu(h @ w + b, approximate=True)
        h = h @ params["mlp_out"][0] + params["mlp_out"][1]
        h = h + identity                       # MLP-internal residual
        return (x_out + h.reshape(B, S, C)).astype(x.dtype)


# ----------------------------- demo -----------------------------

if __name__ == "__main__":
    # C is a multiple of 128 (lane-dense output); S chosen so the flash KV axis,
    # multiple q blocks, and both batches are exercised (grid = (2, 2, 2)).
    B, S, C, H = 2, 256, 128, 8   # head_dim = 16

    root = jax.random.PRNGKey(0)
    k_params, k_x, k_mask = jax.random.split(root, 3)

    params = init_attention_params(k_params, C, mlp_ratio=1.0)
    x = jax.random.normal(k_x, (B, S, C), jnp.float32)
    # mask covers 3 modalities concatenated along the sequence axis: (B, 3*S)
    mask = (jax.random.uniform(k_mask, (B, 3 * S)) > 0.3).astype(jnp.int32)
    # Batch 1 fully masked for modality "a" -> exercises the zero-row (torch NaN->0) path.
    mask = mask.at[1, :S].set(0)

    fwd = functools.partial(attention_forward, num_heads=H, q_block=128, kv_block=128)

    out = jax.block_until_ready(fwd(params, x, "a", mask))
    ref = jax.block_until_ready(attention_reference(params, x, "a", mask, num_heads=H))
    assert out.shape == (B, S, C) and out.dtype == jnp.float32
    assert bool(jnp.all(jnp.isfinite(out)))
    assert bool(jnp.allclose(out, ref, rtol=2e-2, atol=2e-2)), \
        float(jnp.max(jnp.abs(out - ref)))

    out_nm = jax.block_until_ready(fwd(params, x, "a", None))
    ref_nm = jax.block_until_ready(attention_reference(params, x, "a", None, num_heads=H))
    assert out_nm.shape == (B, S, C)
    assert bool(jnp.all(jnp.isfinite(out_nm)))
    assert bool(jnp.allclose(out_nm, ref_nm, rtol=2e-2, atol=2e-2)), \
        float(jnp.max(jnp.abs(out_nm - ref_nm)))

    print("KERNEL_OK")
</pallas_src>

<mosaic_0001>
module attributes {stable_mosaic.version = 11 : i64} {
  func.func @_linear_bias_kernel(%arg0: i32, %arg1: i32, %arg2: i32, %arg3: memref<256x128xf32, #tpu.memory_space<vmem>>, %arg4: memref<128x384xf32, #tpu.memory_space<vmem>>, %arg5: memref<1x384xf32, #tpu.memory_space<vmem>>, %arg6: memref<256x384xf32, #tpu.memory_space<vmem>>, %arg7: memref<256x384xf32, #tpu.memory_space<vmem>>) attributes {dimension_semantics = [#tpu.dimension_semantics<parallel>, #tpu.dimension_semantics<parallel>, #tpu.dimension_semantics<arbitrary>], iteration_bounds = array<i64: 2, 1, 1>, scalar_prefetch = 0 : i64, scratch_operands = 1 : i64, tpu.core_type = #tpu.core_type<tc>, window_params = [{transform_indices = @transform_0, window_bounds = array<i64: 256, 128>}, {transform_indices = @transform_1, window_bounds = array<i64: 128, 384>}, {transform_indices = @transform_2, window_bounds = array<i64: 1, 384>}, {transform_indices = @transform_3, window_bounds = array<i64: 256, 384>}]} {
    %c0_i32 = arith.constant 0 : i32
    %0 = arith.cmpi eq, %arg2, %c0_i32 : i32
    %1 = arith.extui %0 : i1 to i32
    %c0_i32_0 = arith.constant 0 : i32
    %2 = arith.cmpi ne, %1, %c0_i32_0 : i32
    scf.if %2 {
      %cst_10 = arith.constant 0.000000e+00 : f32
      %12 = vector.broadcast %cst_10 : f32 to vector<256x384xf32>
      %c0_11 = arith.constant 0 : index
      %c0_12 = arith.constant 0 : index
      %13 = vector.load %arg7[%c0_11, %c0_12] : memref<256x384xf32, #tpu.memory_space<vmem>>, vector<256x384xf32>
      tpu.vector_store %arg7[%c0_11, %c0_12], %12 {strides = array<i32>} : memref<256x384xf32, #tpu.memory_space<vmem>>, vector<256x384xf32>,
    } else {
    }
    %c0 = arith.constant 0 : index
    %c0_1 = arith.constant 0 : index
    %3 = vector.load %arg7[%c0, %c0_1] : memref<256x384xf32, #tpu.memory_space<vmem>>, vector<256x384xf32>
    %c0_2 = arith.constant 0 : index
    %c0_3 = arith.constant 0 : index
    %4 = vector.load %arg3[%c0_2, %c0_3] : memref<256x128xf32, #tpu.memory_space<vmem>>, vector<256x128xf32>
    %c0_4 = arith.constant 0 : index
    %c0_5 = arith.constant 0 : index
    %5 = vector.load %arg4[%c0_4, %c0_5] : memref<128x384xf32, #tpu.memory_space<vmem>>, vector<128x384xf32>
    %cst = arith.constant dense<0.000000e+00> : vector<256x384xf32>
    %6 = tpu.matmul %4, %5, %cst {dimension_numbers = #tpu.dot_dimension_numbers<[1], [0], [0], [1], [0, 0, 1, 1], [], []>} : vector<256x128xf32>, vector<128x384xf32>, vector<256x384xf32> -> vector<256x384xf32>
    %7 = arith.addf %3, %6 : vector<256x384xf32>
    %c0_6 = arith.constant 0 : index
    %c0_7 = arith.constant 0 : index
    %8 = vector.load %arg7[%c0_6, %c0_7] : memref<256x384xf32, #tpu.memory_space<vmem>>, vector<256x384xf32>
    tpu.vector_store %arg7[%c0_6, %c0_7], %7 {strides = array<i32>} : memref<256x384xf32, #tpu.memory_space<vmem>>, vector<256x384xf32>,
    %c0_i32_8 = arith.constant 0 : i32
    %9 = arith.cmpi eq, %arg2, %c0_i32_8 : i32
    %10 = arith.extui %9 : i1 to i32
    %c0_i32_9 = arith.constant 0 : i32
    %11 = arith.cmpi ne, %10, %c0_i32_9 : i32
    scf.if %11 {
      %c0_10 = arith.constant 0 : index
      %c0_11 = arith.constant 0 : index
      %12 = vector.load %arg7[%c0_10, %c0_11] : memref<256x384xf32, #tpu.memory_space<vmem>>, vector<256x384xf32>
      %c0_12 = arith.constant 0 : index
      %c0_13 = arith.constant 0 : index
      %13 = vector.load %arg5[%c0_12, %c0_13] : memref<1x384xf32, #tpu.memory_space<vmem>>, vector<1x384xf32>
      %14 = vector.broadcast %13 : vector<1x384xf32> to vector<256x384xf32>
      %15 = arith.addf %12, %14 : vector<256x384xf32>
      %c0_14 = arith.constant 0 : index
      %c0_15 = arith.constant 0 : index
      %16 = vector.load %arg6[%c0_14, %c0_15] : memref<256x384xf32, #tpu.memory_space<vmem>>, vector<256x384xf32>
      tpu.vector_store %arg6[%c0_14, %c0_15], %15 {strides = array<i32>} : memref<256x384xf32, #tpu.memory_space<vmem>>, vector<256x384xf32>,
    } else {
    }
    return
  }
  func.func @transform_0(%arg0: i32, %arg1: i32, %arg2: i32) -> (i32, i32) {
    %c0_i32 = arith.constant 0 : i32
    return %arg0, %arg2 : i32, i32
  }
  func.func @transform_1(%arg0: i32, %arg1: i32, %arg2: i32) -> (i32, i32) {
    %c0_i32 = arith.constant 0 : i32
    return %arg2, %arg1 : i32, i32
  }
  func.func @transform_2(%arg0: i32, %arg1: i32, %arg2: i32) -> (i32, i32) {
    %c0_i32 = arith.constant 0 : i32
    %c0_i32_0 = arith.constant 0 : i32
    return %c0_i32, %arg1 : i32, i32
  }
  func.func @transform_3(%arg0: i32, %arg1: i32, %arg2: i32) -> (i32, i32) {
    %c0_i32 = arith.constant 0 : i32
    return %arg0, %arg1 : i32, i32
  }
}

</mosaic_0001>

<bundles_post_ra>
// kernel: tpu_custom_call.1
= control target key start
LH: loop header
LB: loop body
LE: loop exit
PB: predicated region body
PF: predicated region fallthrough
CT: control target
= control target key end

     0   :  { %8 = vsyncpa [#allocation4], 0  ;;  %s2684_s0 = inlined_call_operand.hbm [shape: f32[512,128], index: 0, kind: input, shape index: {}]   ;;  %s2685_s1 = inlined_call_operand.hbm [shape: f32[128,384], index: 1, kind: input, shape index: {}]   ;;  %s2686_s2 = inlined_call_operand.vmem [shape: f32[1,384], index: 2, kind: input, shape index: {}]   ;;  %s2687_s3 = inlined_call_operand.hbm [shape: f32[512,384], index: 3, kind: output, shape index: {}]  }
   0x1   :  { %10 = vsyncpa [#allocation4 + $0x1], 0 }
   0x2   :  { %11 = vsyncpa [#allocation7], 0 }
   0x3   :  { %12 = vsyncpa [#allocation5], 0 }
   0x4   :  { %14 = vsyncpa [#allocation5 + $0x1], 0  ;;  %s2140_s12 = smov 0   ;;  %s2142_s13 = smov 0  }
   0x5   :  { %s2144_s14 = smov 0   ;;  %s2146_s15 = smov 0  }
   0x6   :  { %s2148_s16 = smov 0   ;;  %s2150_s17 = smov 0  }
   0x7 LB: > { %s1656_s18 = sadd.s32 4294967295, %s2108_s17   ;;  %s1657_s19 = sadd.s32 4294967294, %s2108_s17   ;;  %s2108_s17 = sphi %s2150_s17, %s20_s17   ;;  %s2104_s16 = sphi %s2148_s16, %s2711_s16   ;;  %s2100_s15 = sphi %s2146_s15, %s2710_s15   ;;  %s2096_s14 = sphi %s2144_s14, %s2709_s14   ;;  %s2092_s13 = sphi %s2142_s13, %s2708_s13   ;;  %s2088_s12 = sphi %s2140_s12, %s2707_s12  }
   0x8   : > { %p61_p0 = scmp.ne.s32.totalorder %s2092_s13, %s2088_s12  ;;  %p2174_p1 = scmp.eq.s32.totalorder %s1656_s18, 0 }
   0x9   : > { %p2178_p2 = scmp.eq.s32.totalorder %s1656_s18, 1  ;;  %p147_p3 = scmp.eq.s32.totalorder %s1657_s19, 1 }
   0xa   : > { %s2692_s20 = scalar_select %p2174_p1, 1, 0 }
   0xb   : > { %s2693_s21 = scalar_select %p2178_p2, 1, 0 }
   0xc   : > { %p2184_p4 = por %p2174_p1, %p61_p0  ;;  %p1658_p5 = scmp.ge.s32.totalorder %s2108_s17, 1 }
   0xd   : > { %p2189_p6 = por %p147_p3, %p61_p0  ;;  %p154_p7 = scmp.lt.s32.totalorder %s2108_s17, 3 }
   0xe   : > { %s2694_s22 = scalar_select %p2184_p4, 1, 0 }
   0xf   : > { %s2695_s23 = scalar_select %p2189_p6, 1, 0 }
  0x10   : > { %p2194_p8 = pnand %p1658_p5, %p154_p7  ;;  %s2110_s25 = smov [#allocation6]  }
  0x11   : > { %s172_s26 = sshll.u32 %s2110_s25, 4  ;;  %s39_s28 = sadd.s32 1, %s2104_s16  ;;  %s173_s26 = int_to_ptr.vmem [resolvable:$true] %s172_s26 }
  0x12   : > { %s2696_s24 = scalar_select %p2194_p8, 1, 0 }
  0x13   : > { %p1892_p9 = pneg %p2194_p8  ;;  %s1964_s4 = scalar_lea.hbm %s2685_s1, 6144 }
  0x14   : > { %p1965_p12 = scmp.ne.s32.totalorder %s2685_s1, %s1964_s4  ;;  %p1971_p5 = scmp.lt.u32.totalorder %s1964_s4, %s2685_s1 }
  0x15   : > { %p2203_p11 = pnand %p1892_p9, %p2174_p1 }
  0x17   : > { %p1966_p13 = pneg %p2203_p11 }
  0x19   : > { %p1967_p0 = pnand %p1966_p13, %p1965_p12 }
  0x1b   : > { %p1968_p3 = pneg %p1967_p0 }
  0x1d   : > { %p1973_p7 = pnand %p1971_p5, %p1968_p3 }
  0x1f   : > { %1976 = shalt.err (!%p1973_p7)
}
  0x20   : > { %s1977_s9 = scalar_lea.vmem %s173_s26, 6144  ;;  %p1985_p1 = scmp.lt.s32.totalorder %s173_s26, %s173_s26 }
  0x21   : > { %p1978_p9 = scmp.ne.s32.totalorder %s173_s26, %s1977_s9  ;;  %p1986_p4 = scmp.lt.s32.totalorder %s1977_s9, %s1977_s9 }
  0x23   : > { %p1980_p10 = pnand %p1978_p9, %p1966_p13  ;;  %p1987_p8 = por %p1986_p4, %p1985_p1 }
  0x25   : > { %p1981_p6 = pneg %p1980_p10 }
  0x27   : > { %p1988_p2 = pnand %p1987_p8, %p1981_p6 }
  0x29   : > { %1991 = shalt.err (!%p1988_p2)
}
  0x2a   : > { %s2111_s10 = smov 384   ;;  %s2112_s11 = smov 24  }
  0x2b   : > { %1895 = dma.hbm_to_vmem [thread:$0]  (!%p2203_p11), %s2685_s1, 6144, %s173_s26, [#allocation7], %s2111_s10, %s2111_s10, %s2112_s11  }
  0x2c   : > { %p41_p1 = scmp.ge.s32.totalorder %s39_s28, 2  ;;  %s48_s25 = sadd.s32 1, %s2096_s14 }
  0x2d   : > { %p55_p2 = scmp.ne.s32.totalorder %s2096_s14, %s2092_s13  ;;  %p56_p4 = scmp.eq.s32.totalorder %s2108_s17, 0 }
  0x2e   : > { %s2713_s28 = smov (%p41_p1, %s39_s28), 0  ;;  %p2699_p8 = scmp.ne.s32.totalorder %s2693_s21, 0 }
  0x2f   : > { %p2230_p6 = por %p56_p4, %p55_p2  ;;  %s43_s27 = ssub.s32 %s2104_s16, %s2713_s28 }
  0x30   : > { %p2236_p10 = por %p2699_p8, %p55_p2  ;;  %p1905_p12 = scmp.lt.s32.totalorder %s2108_s17, 2 }
  0x31   : > { %p46_p11 = scmp.eq.s32.totalorder %s43_s27, 0  ;;  %s194_s26 = sand.u32 1, %s2096_s14  }
  0x32   : > { %s1662_s4 = sshll.u32 %s194_s26, 8  ;;  %s1673_s6 = sshll.u32 %s2104_s16, 12 }
  0x33   : > { %s2245_s5 = scalar_select %p46_p11, %s2096_s14, %s48_s25  }
  0x34   : > { %s2251_s9 = scalar_lea.hbm %s2684_s0, %s1673_s6  ;;  %s198_s21 = scalar_lea.vmem [#allocation3], %s1662_s4 }
  0x35   : > { %s206_s10 = sshll.u32 %s198_s21, 4  ;;  %p2257_p13 = pnand %p1905_p12, %p2230_p6  ;;  %s2253_s10 = int_to_ptr.vmem [resolvable:$true] %s206_s10 }
  0x36   : > { %s2261_s18 = scalar_lea.sflag [#allocation4], %s194_s26  ;;  %s1992_s19 = scalar_lea.hbm %s2251_s9, 4096 }
  0x37   : > { %p1993_p0 = scmp.ne.s32.totalorder %s2251_s9, %s1992_s19  ;;  %p1994_p3 = pneg %p2257_p13 }
  0x38   : > { %s1997_s29 = scalar_lea.hbm %s2684_s0, 8192  ;;  %p1998_p9 = scmp.lt.u32.totalorder %s2251_s9, %s2684_s0 }
  0x39   : > { %p1995_p5 = pnand %p1994_p3, %p1993_p0  ;;  %p1999_p1 = scmp.lt.u32.totalorder %s1997_s29, %s1992_s19 }
  0x3a   : > { %p2001_p4 = scmp.lt.u32.totalorder %s1992_s19, %s2251_s9 }
  0x3b   : > { %p1996_p7 = pneg %p1995_p5  ;;  %p2000_p2 = por %p1999_p1, %p1998_p9 }
  0x3d   : > { %p2002_p6 = por %p2001_p4, %p2000_p2 }
  0x3f   : > { %p2003_p8 = pnand %p2002_p6, %p1996_p7 }
  0x41   : > { %2006 = shalt.err (!%p2003_p8)
}
  0x42   : > { %s2007_s26 = scalar_lea.vmem %s2253_s10, 4096  ;;  %s2113_s7 = smov [#allocation3]  }
  0x43   : > { %p2008_p12 = scmp.ne.s32.totalorder %s2253_s10, %s2007_s26  ;;  %s2012_s8 = sshll.u32 %s2113_s7, 4  ;;  %s2013_s8 = int_to_ptr.vmem [resolvable:$false] %s2012_s8 }
  0x44   : > { %s2014_s21 = scalar_lea.vmem %s2013_s8, 8192  ;;  %p2015_p5 = scmp.lt.s32.totalorder %s2253_s10, %s2013_s8 }
  0x45   : > { %p2010_p11 = pnand %p2008_p12, %p1994_p3  ;;  %p2016_p9 = scmp.lt.s32.totalorder %s2014_s21, %s2007_s26 }
  0x47   : > { %p2011_p0 = pneg %p2010_p11  ;;  %p2017_p1 = por %p2016_p9, %p2015_p5 }
  0x49   : > { %p2018_p2 = pnand %p2017_p1, %p2011_p0 }
  0x4b   : > { %2021 = shalt.err (!%p2018_p2)
}
  0x4c   : > { %s2114_s19 = smov 128   ;;  %s2115_s25 = smov 8  }
  0x4d   : > { %1899 = dma.hbm_to_vmem [thread:$0]  (!%p2257_p13), %s2251_s9, 4096, %s2253_s10, %s2261_s18, %s2114_s19, %s2114_s19, %s2115_s25  }
  0x4e   : > { %p2702_p3 = scmp.ne.s32.totalorder %s2696_s24, 0 }
  0x4f   : > { %s2292_s27 = sand.u32 (!%p2702_p3), 1, %s2092_s13   ;;  %p2703_p7 = scmp.ne.s32.totalorder (!%p2702_p3), %s2694_s22, 0 }
  0x50   : > { %218 = sbr.rel (%p2702_p3) target bundleno = 448 (0x1c0), region = 32  ;;  %s1666_s29 = sshll.u32 (!%p2702_p3), %s2292_s27, 8 }
  0x51   : > { %s221_s4 = scalar_lea.sflag (!%p2702_p3), [#allocation4], %s2292_s27  ;;  %s2296_s6 = scalar_lea.vmem (!%p2702_p3), [#allocation3], %s1666_s29 }
  0x57   : > { %2075 = dma.done.wait (%p2703_p7), %s221_s4, 4096  }
  0x58   : > { %2077 = vsyncadd (%p2703_p7), %s221_s4, 4294963200  ;;  %p2704_p13 = scmp.ne.s32.totalorder %s2692_s20, 0 }
  0x5a   : > { %2079 = dma.done.wait (%p2704_p13), [#allocation7], 6144  }
  0x5b   : > { %2081 = vsyncadd (%p2704_p13), [#allocation7], 4294961152  ;;  %v2116_v0 = vmov 0.0   ;;  %v494_v1 = vld [vmem:[#allocation6 + $0x8] sm:$0xff]  ;;  %v497_v2 = vld [vmem:[#allocation6 + $0x20] sm:$0xff]  ;;  %s1882_s24 = smul.u32 768, %s2292_s27 }
  0x5c   : > { %605 = vmatprep.mubr.f32.mxu0 %v2116_v0  ;;  %749 = vmatprep.mubr.f32.mxu1 %v2116_v0  ;;  %v493_v3 = vld [vmem:[#allocation6] sm:$0xff]  ;;  %v1802_v4 = vpack.c.bf16 %v497_v2, %v494_v1  ;;  %v496_v5 = vld [vmem:[#allocation6 + $0x18] sm:$0xff]  ;;  %v503_v7 = vld [vmem:[#allocation6 + $0x50] sm:$0xff]  ;;  %s1883_s10 = smul.u32 12288, %s2100_s15  ;;  %s1524_s7 = scalar_lea.sflag [#allocation5], %s2292_s27 }
  0x5d   : > { %v500_v6 = vld [vmem:[#allocation6 + $0x38] sm:$0xff]  ;;  %v1804_v8 = vpack.c.bf16 %v496_v5, %v493_v3  ;;  %v499_v10 = vld [vmem:[#allocation6 + $0x30] sm:$0xff]  ;;  %v502_v11 = vld [vmem:[#allocation6 + $0x48] sm:$0xff]  ;;  %s2434_s9 = scalar_lea.vmem [#allocation8], %s1882_s24  ;;  %s2117_s21 = smov [#allocation8]  }
  0x5e   : > { %v1806_v9 = vpack.c.bf16 %v503_v7, %v500_v6  ;;  %v506_v12 = vld [vmem:[#allocation6 + $0x68] sm:$0xff]  ;;  %1803 = vmatprep.subr.bf16.mxu0 %v1802_v4  ;;  %1866 = vmatprep.subr.bf16.mxu1 %v1802_v4  ;;  %v509_v13 = vld [vmem:[#allocation6 + $0x80] sm:$0xff]  ;;  %v1808_v14 = vpack.c.bf16 %v502_v11, %v499_v10  ;;  %v508_v17 = vld [vmem:[#allocation6 + $0x78] sm:$0xff]  ;;  %s1540_s11 = sshll.u32 %s2434_s9, 4  ;;  %s2627_s26 = scalar_lea.hbm %s2687_s3, %s1883_s10  ;;  %s2629_s11 = int_to_ptr.vmem [resolvable:$true] %s1540_s11 }
  0x5f   : > { %1805 = vmatpush1.bf16.msra.mxu0 %v1804_v8  ;;  %1874 = vmatpush1.bf16.msra.mxu1 %v1804_v8  ;;  %v1810_v15 = vpack.c.bf16 %v509_v13, %v506_v12  ;;  %v505_v16 = vld [vmem:[#allocation6 + $0x60] sm:$0xff]  ;;  %v512_v18 = vld [vmem:[#allocation6 + $0x98] sm:$0xff]  ;;  %v515_v19 = vld [vmem:[#allocation6 + $0xb0] sm:$0xff]  ;;  %s2022_s8 = scalar_lea.vmem %s2629_s11, 12288  ;;  %s2026_s19 = sshll.u32 %s2117_s21, 4  ;;  %s2027_s19 = int_to_ptr.vmem [resolvable:$false] %s2026_s19 }
  0x60   : > { %1807 = vmatprep.subr.bf16.mxu0 %v1806_v9  ;;  %1867 = vmatprep.subr.bf16.mxu1 %v1806_v9  ;;  %v1812_v20 = vpack.c.bf16 %v508_v17, %v505_v16  ;;  %v1814_v21 = vpack.c.bf16 %v515_v19, %v512_v18  ;;  %v511_v22 = vld [vmem:[#allocation6 + $0x90] sm:$0xff]  ;;  %v514_v23 = vld [vmem:[#allocation6 + $0xa8] sm:$0xff]  ;;  %v521_v25 = vld [vmem:[#allocation6 + $0xe0] sm:$0xff]  ;;  %p2023_p4 = scmp.ne.s32.totalorder %s2629_s11, %s2022_s8  ;;  %s2028_s25 = scalar_lea.vmem %s2027_s19, 24576 }
  0x61   : > { %v518_v24 = vld [vmem:[#allocation6 + $0xc8] sm:$0xff]  ;;  %v1816_v26 = vpack.c.bf16 %v514_v23, %v511_v22  ;;  %v517_v28 = vld [vmem:[#allocation6 + $0xc0] sm:$0xff]  ;;  %v520_v29 = vld [vmem:[#allocation6 + $0xd8] sm:$0xff]  ;;  %p2029_p12 = scmp.lt.s32.totalorder %s2629_s11, %s2027_s19  ;;  %p2030_p11 = scmp.lt.s32.totalorder %s2028_s25, %s2022_s8 }
  0x62   : > { %v1818_v27 = vpack.c.bf16 %v521_v25, %v518_v24  ;;  %v524_v30 = vld [vmem:[#allocation6 + $0xf8] sm:$0xff]  ;;  %v527_v31 = vld [vmem:[#allocation6 + $0x110] sm:$0xff]  ;;  %v1820_v32 = vpack.c.bf16 %v520_v29, %v517_v28  ;;  %v526_v35 = vld [vmem:[#allocation6 + $0x108] sm:$0xff]  ;;  %p2024_p6 = pnand %p2023_p4, %p2236_p10 }
  0x63   : > { %1809 = vmatpush1.bf16.msra.mxu0 %v1808_v14  ;;  %1875 = vmatpush1.bf16.msra.mxu1 %v1808_v14  ;;  %v1822_v33 = vpack.c.bf16 %v527_v31, %v524_v30  ;;  %v523_v34 = vld [vmem:[#allocation6 + $0xf0] sm:$0xff]  ;;  %v530_v36 = vld [vmem:[#allocation6 + $0x128] sm:$0xff]  ;;  %v533_v37 = vld [vmem:[#allocation6 + $0x140] sm:$0xff]  ;;  %p2031_p0 = por %p2030_p11, %p2029_p12 }
  0x64   : > { %1811 = vmatprep.subr.bf16.mxu0 %v1810_v15  ;;  %1868 = vmatprep.subr.bf16.mxu1 %v1810_v15  ;;  %v1824_v38 = vpack.c.bf16 %v526_v35, %v523_v34  ;;  %v1826_v39 = vpack.c.bf16 %v533_v37, %v530_v36  ;;  %v529_v40 = vld [vmem:[#allocation6 + $0x120] sm:$0xff]  ;;  %v532_v41 = vld [vmem:[#allocation6 + $0x138] sm:$0xff]  ;;  %v539_v43 = vld [vmem:[#allocation6 + $0x170] sm:$0xff]  ;;  %p2025_p8 = pneg %p2024_p6 }
  0x65   : > { %v536_v42 = vld [vmem:[#allocation6 + $0x158] sm:$0xff]  ;;  %v1828_v44 = vpack.c.bf16 %v532_v41, %v529_v40  ;;  %v535_v46 = vld [vmem:[#allocation6 + $0x150] sm:$0xff]  ;;  %v538_v47 = vld [vmem:[#allocation6 + $0x168] sm:$0xff] }
  0x66   : > { %v1830_v45 = vpack.c.bf16 %v539_v43, %v536_v42  ;;  %v495_v48 = vld [vmem:[#allocation6 + $0x10] sm:$0xff]  ;;  %v498_v49 = vld [vmem:[#allocation6 + $0x28] sm:$0xff]  ;;  %v1832_v50 = vpack.c.bf16 %v538_v47, %v535_v46  ;;  %v501_v52 = vld [vmem:[#allocation6 + $0x40] sm:$0xff]  ;;  %v1316_v42 = vlaneseq  ;;  %p2032_p5 = pnand %p2031_p0, %p2025_p8 }
  0x67   : > { %1813 = vmatpush1.bf16.msra.mxu0 %v1812_v20  ;;  %1876 = vmatpush1.bf16.msra.mxu1 %v1812_v20  ;;  %v1834_v51 = vpack.c.bf16 %v498_v49, %v495_v48  ;;  %v504_v53 = vld [vmem:[#allocation6 + $0x58] sm:$0xff]  ;;  %v2309_v54 = vld [vmem:[%s2296_s6] sm:$0xff]  ;;  %v507_v57 = vld [vmem:[#allocation6 + $0x70] sm:$0xff] }
  0x68   : > { %1815 = vmatprep.subr.bf16.mxu0 %v1814_v21  ;;  %1869 = vmatprep.subr.bf16.mxu1 %v1814_v21  ;;  %v2312_v55 = vld [vmem:[%s2296_s6 + $0xc0] sm:$0xff]  ;;  %v1838_v56 = vpack.c.bf16 %v504_v53, %v501_v52  ;;  %v510_v58 = vld [vmem:[#allocation6 + $0x88] sm:$0xff]  ;;  %v516_v63 = vld [vmem:[#allocation6 + $0xb8] sm:$0xff]  ;;  %v2414_v43 = vshrl.u32 %v1316_v42, 7 }
  0x69   : > { %v2318_v59 = vld [vmem:[%s2296_s6 + $0x8] sm:$0xff]  ;;  %v1842_v61 = vpack.c.bf16 %v510_v58, %v507_v57  ;;  %v513_v62 = vld [vmem:[#allocation6 + $0xa0] sm:$0xff]  ;;  %v2328_v1 = vld [vmem:[%s2296_s6 + $0x10] sm:$0xff] }
  0x6a   : > { %v2321_v60 = vld [vmem:[%s2296_s6 + $0xc8] sm:$0xff]  ;;  %v2331_v2 = vld [vmem:[%s2296_s6 + $0xd0] sm:$0xff]  ;;  %v1846_v3 = vpack.c.bf16 %v516_v63, %v513_v62  ;;  %v464_v6 = vld [vmem:[%s2296_s6 + $0x18] sm:$0xff]  ;;  %v1322_v46 = vsub.s32 1, %v2414_v43 }
  0x6b   : > { %1817 = vmatpush1.bf16.msra.mxu0 %v1816_v26  ;;  %1877 = vmatpush1.bf16.msra.mxu1 %v1816_v26  ;;  %v519_v4 = vld [vmem:[#allocation6 + $0xd0] sm:$0xff]  ;;  %v522_v5 = vld [vmem:[#allocation6 + $0xe8] sm:$0xff]  ;;  %v2339_v7 = vld [vmem:[%s2296_s6 + $0xd8] sm:$0xff] }
  0x6c   : > { %1819 = vmatprep.subr.bf16.mxu0 %v1818_v27  ;;  %1870 = vmatprep.subr.bf16.mxu1 %v1818_v27  ;;  %v1850_v8 = vpack.c.bf16 %v522_v5, %v519_v4  ;;  %v525_v9 = vld [vmem:[#allocation6 + $0x100] sm:$0xff]  ;;  %v528_v10 = vld [vmem:[#allocation6 + $0x118] sm:$0xff]  ;;  %v531_v14 = vld [vmem:[#allocation6 + $0x130] sm:$0xff] }
  0x6d   : > { %v465_v11 = vld [vmem:[%s2296_s6 + $0x20] sm:$0xff]  ;;  %v1854_v13 = vpack.c.bf16 %v528_v10, %v525_v9  ;;  %v534_v15 = vld [vmem:[#allocation6 + $0x148] sm:$0xff]  ;;  %v540_v20 = vld [vmem:[#allocation6 + $0x178] sm:$0xff] }
  0x6e   : > { %v2346_v12 = vld [vmem:[%s2296_s6 + $0xe0] sm:$0xff]  ;;  %v466_v16 = vld [vmem:[%s2296_s6 + $0x28] sm:$0xff]  ;;  %v1858_v18 = vpack.c.bf16 %v534_v15, %v531_v14  ;;  %v467_v21 = vld [vmem:[%s2296_s6 + $0x30] sm:$0xff] }
  0x6f   : > { %1821 = vmatpush1.bf16.msra.mxu0 %v1820_v32  ;;  %1878 = vmatpush1.bf16.msra.mxu1 %v1820_v32  ;;  %v2353_v17 = vld [vmem:[%s2296_s6 + $0xe8] sm:$0xff]  ;;  %v537_v19 = vld [vmem:[#allocation6 + $0x160] sm:$0xff]  ;;  %v2360_v22 = vld [vmem:[%s2296_s6 + $0xf0] sm:$0xff] }
  0x70   : > { %1823 = vmatprep.subr.bf16.mxu0 %v1822_v33  ;;  %1871 = vmatprep.subr.bf16.mxu1 %v1822_v33  ;;  %v1862_v23 = vpack.c.bf16 %v540_v20, %v537_v19  ;;  %v468_v24 = vld [vmem:[%s2296_s6 + $0x38] sm:$0xff]  ;;  %v469_v26 = vld [vmem:[%s2296_s6 + $0x40] sm:$0xff]  ;;  %v470_v27 = vld [vmem:[%s2296_s6 + $0x48] sm:$0xff] }
  0x71   : > { %v2367_v25 = vld [vmem:[%s2296_s6 + $0xf8] sm:$0xff]  ;;  %v471_v28 = vld [vmem:[%s2296_s6 + $0x50] sm:$0xff]  ;;  %v473_v30 = vld [vmem:[%s2296_s6 + $0x60] sm:$0xff] }
  0x72   : > { %v472_v29 = vld [vmem:[%s2296_s6 + $0x58] sm:$0xff]  ;;  %v474_v31 = vld [vmem:[%s2296_s6 + $0x68] sm:$0xff]  ;;  %v475_v32 = vld [vmem:[%s2296_s6 + $0x70] sm:$0xff] }
  0x73   : > { %1825 = vmatpush1.bf16.msra.mxu0 %v1824_v38  ;;  %1879 = vmatpush1.bf16.msra.mxu1 %v1824_v38  ;;  %v476_v33 = vld [vmem:[%s2296_s6 + $0x78] sm:$0xff]  ;;  %v477_v34 = vld [vmem:[%s2296_s6 + $0x80] sm:$0xff]  ;;  %v478_v35 = vld [vmem:[%s2296_s6 + $0x88] sm:$0xff] }
  0x74   : > { %1827 = vmatprep.subr.bf16.mxu0 %v1826_v39  ;;  %1872 = vmatprep.subr.bf16.mxu1 %v1826_v39  ;;  %v479_v36 = vld [vmem:[%s2296_s6 + $0x90] sm:$0xff]  ;;  %v480_v37 = vld [vmem:[%s2296_s6 + $0x98] sm:$0xff]  ;;  %v481_v38 = vld [vmem:[%s2296_s6 + $0xa0] sm:$0xff] }
  0x75   : > { %v482_v39 = vld [vmem:[%s2296_s6 + $0xa8] sm:$0xff]  ;;  %v483_v40 = vld [vmem:[%s2296_s6 + $0xb0] sm:$0xff]  ;;  %v484_v41 = vld [vmem:[%s2296_s6 + $0xb8] sm:$0xff] }
  0x77   : > { %1829 = vmatpush1.bf16.msra.mxu0 %v1828_v44  ;;  %1880 = vmatpush1.bf16.msra.mxu1 %v1828_v44  ;;  %v1318_v44 = vsub.s32 0, %v2414_v43 }
  0x78   : > { %1831 = vmatprep.subr.bf16.mxu0 %v1830_v45  ;;  %1873 = vmatprep.subr.bf16.mxu1 %v1830_v45  ;;  %v2420_v45 = vld [vmem:[%s2686_s2] sm:$0x7] }
  0x79   : > { %v2428_v47 = vrot.slane %v2420_v45, %v1322_v46 }
  0x7b   : > { %1833 = vmatpush1.bf16.msra.mxu0 %v1832_v50  ;;  %1881 = vmatpush1.bf16.msra.mxu1 %v1832_v50 }
  0x7c   : > { %1835 = vmatprep.subr.bf16.mxu1 %v1834_v51 }
  0x7e   : > { %606 = vmatmul.mubr.f32.vlgmr.msra.gmra.mrb[0].mxu0 %v2309_v54  ;;  %750 = vmatmul.mubr.f32.vlgmr.msra.gmra.mrb[0].mxu1 %v2312_v55 }
  0x7f   : > { %1837 = vmatpush3.bf16.msra.mxu1 %v1834_v51  ;;  %611 = vmatprep.mubr.f32.mxu0 %v2116_v0 }
  0x80   : > { %755 = vmatprep.mubr.f32.mxu1 %v2116_v0  ;;  %1839 = vmatprep.subr.bf16.mxu1 %v1838_v56 }
  0x82   : > { %612 = vmatmul.mubr.f32.gmra.mrb[2].mxu0 %v2318_v59  ;;  %756 = vmatmul.mubr.f32.gmra.mrb[2].mxu1 %v2321_v60 }
  0x83   : > { %1841 = vmatpush3.bf16.msra.mxu1 %v1838_v56  ;;  %617 = vmatprep.mubr.f32.mxu0 %v2116_v0 }
  0x84   : > { %761 = vmatprep.mubr.f32.mxu1 %v2116_v0  ;;  %1843 = vmatprep.subr.bf16.mxu1 %v1842_v61 }
  0x86   : > { %618 = vmatmul.mubr.f32.gmra.mrb[4].mxu0 %v2328_v1  ;;  %762 = vmatmul.mubr.f32.gmra.mrb[4].mxu1 %v2331_v2 }
  0x87   : > { %1845 = vmatpush3.bf16.msra.mxu1 %v1842_v61  ;;  %623 = vmatprep.mubr.f32.mxu0 %v2116_v0 }
  0x88   : > { %767 = vmatprep.mubr.f32.mxu1 %v2116_v0  ;;  %1847 = vmatprep.subr.bf16.mxu1 %v1846_v3 }
  0x8a   : > { %624 = vmatmul.mubr.f32.gmra.mrb[6].mxu0 %v464_v6  ;;  %768 = vmatmul.mubr.f32.gmra.mrb[6].mxu1 %v2339_v7 }
  0x8b   : > { %1849 = vmatpush3.bf16.msra.mxu1 %v1846_v3  ;;  %629 = vmatprep.mubr.f32.mxu0 %v2116_v0 }
  0x8c   : > { %773 = vmatprep.mubr.f32.mxu1 %v2116_v0  ;;  %1851 = vmatprep.subr.bf16.mxu1 %v1850_v8 }
  0x8e   : > { %630 = vmatmul.mubr.f32.gmra.mrb[8].mxu0 %v465_v11  ;;  %774 = vmatmul.mubr.f32.gmra.mrb[8].mxu1 %v2346_v12 }
  0x8f   : > { %1853 = vmatpush3.bf16.msra.mxu1 %v1850_v8  ;;  %635 = vmatprep.mubr.f32.mxu0 %v2116_v0 }
  0x90   : > { %779 = vmatprep.mubr.f32.mxu1 %v2116_v0  ;;  %1855 = vmatprep.subr.bf16.mxu1 %v1854_v13 }
  0x92   : > { %636 = vmatmul.mubr.f32.gmra.mrb[10].mxu0 %v466_v16  ;;  %780 = vmatmul.mubr.f32.gmra.mrb[10].mxu1 %v2353_v17 }
  0x93   : > { %1857 = vmatpush3.bf16.msra.mxu1 %v1854_v13  ;;  %641 = vmatprep.mubr.f32.mxu0 %v2116_v0 }
  0x94   : > { %785 = vmatprep.mubr.f32.mxu1 %v2116_v0  ;;  %1859 = vmatprep.subr.bf16.mxu1 %v1858_v18 }
  0x96   : > { %642 = vmatmul.mubr.f32.gmra.mrb[12].mxu0 %v467_v21  ;;  %786 = vmatmul.mubr.f32.gmra.mrb[12].mxu1 %v2360_v22 }
  0x97   : > { %1861 = vmatpush3.bf16.msra.mxu1 %v1858_v18  ;;  %647 = vmatprep.mubr.f32.mxu0 %v2116_v0 }
  0x98   : > { %791 = vmatprep.mubr.f32.mxu1 %v2116_v0  ;;  %1863 = vmatprep.subr.bf16.mxu1 %v1862_v23 }
  0x9a   : > { %648 = vmatmul.mubr.f32.gmra.mrb[14].mxu0 %v468_v24  ;;  %792 = vmatmul.mubr.f32.gmra.mrb[14].mxu1 %v2367_v25 }
  0x9b   : > { %1865 = vmatpush3.bf16.msra.mxu1 %v1862_v23  ;;  %653 = vmatprep.mubr.f32.mxu0 %v2116_v0 }
  0x9c   : > { %1754 = vmatprep.mubr.f32.mxu1 %v2309_v54 }
  0x9e   : > { %654 = vmatmul.mubr.f32.gmra.mrb[16].mxu0 %v469_v26  ;;  %1755 = vmatmul.mubr.f32.vlgmr.msra.gmra.mrb[16].mxu1 %v2318_v59 }
  0x9f   : > { %659 = vmatprep.mubr.f32.mxu0 %v2116_v0  ;;  %1757 = vmatprep.mubr.f32.mxu1 %v2328_v1 }
  0xa2   : > { %660 = vmatmul.mubr.f32.gmra.mrb[18].mxu0 %v470_v27  ;;  %1758 = vmatmul.mubr.f32.gmra.mrb[18].mxu1 %v464_v6 }
  0xa3   : > { %665 = vmatprep.mubr.f32.mxu0 %v2116_v0  ;;  %1760 = vmatprep.mubr.f32.mxu1 %v465_v11 }
  0xa6   : > { %666 = vmatmul.mubr.f32.gmra.mrb[20].mxu0 %v471_v28  ;;  %1761 = vmatmul.mubr.f32.gmra.mrb[20].mxu1 %v466_v16 }
  0xa7   : > { %671 = vmatprep.mubr.f32.mxu0 %v2116_v0  ;;  %1763 = vmatprep.mubr.f32.mxu1 %v467_v21 }
  0xaa   : > { %672 = vmatmul.mubr.f32.gmra.mrb[22].mxu0 %v472_v29  ;;  %1764 = vmatmul.mubr.f32.gmra.mrb[22].mxu1 %v468_v24 }
  0xab   : > { %677 = vmatprep.mubr.f32.mxu0 %v2116_v0  ;;  %1766 = vmatprep.mubr.f32.mxu1 %v469_v26 }
  0xae   : > { %678 = vmatmul.mubr.f32.gmra.mrb[24].mxu0 %v473_v30  ;;  %1767 = vmatmul.mubr.f32.gmra.mrb[24].mxu1 %v470_v27 }
  0xaf   : > { %683 = vmatprep.mubr.f32.mxu0 %v2116_v0  ;;  %1769 = vmatprep.mubr.f32.mxu1 %v471_v28 }
  0xb2   : > { %684 = vmatmul.mubr.f32.gmra.mrb[26].mxu0 %v474_v31  ;;  %1770 = vmatmul.mubr.f32.gmra.mrb[26].mxu1 %v472_v29 }
  0xb3   : > { %689 = vmatprep.mubr.f32.mxu0 %v2116_v0  ;;  %1772 = vmatprep.mubr.f32.mxu1 %v473_v30 }
  0xb6   : > { %690 = vmatmul.mubr.f32.gmra.mrb[28].mxu0 %v475_v32  ;;  %1773 = vmatmul.mubr.f32.gmra.mrb[28].mxu1 %v474_v31 }
  0xb7   : > { %695 = vmatprep.mubr.f32.mxu0 %v2116_v0  ;;  %1775 = vmatprep.mubr.f32.mxu1 %v475_v32 }
  0xba   : > { %696 = vmatmul.mubr.f32.gmra.mrb[30].mxu0 %v476_v33  ;;  %1776 = vmatmul.mubr.f32.gmra.mrb[30].mxu1 %v476_v33 }
  0xbb   : > { %701 = vmatprep.mubr.f32.mxu0 %v2116_v0  ;;  %1778 = vmatprep.mubr.f32.mxu1 %v477_v34 }
  0xbe   : > { %702 = vmatmul.mubr.f32.gmra.mrb[32].mxu0 %v477_v34  ;;  %1779 = vmatmul.mubr.f32.gmra.mrb[32].mxu1 %v478_v35 }
  0xbf   : > { %707 = vmatprep.mubr.f32.mxu0 %v2116_v0  ;;  %1781 = vmatprep.mubr.f32.mxu1 %v479_v36 }
  0xc2   : > { %708 = vmatmul.mubr.f32.gmra.mrb[34].mxu0 %v478_v35  ;;  %1782 = vmatmul.mubr.f32.gmra.mrb[34].mxu1 %v480_v37 }
  0xc3   : > { %713 = vmatprep.mubr.f32.mxu0 %v2116_v0  ;;  %1784 = vmatprep.mubr.f32.mxu1 %v481_v38 }
  0xc6   : > { %714 = vmatmul.mubr.f32.gmra.mrb[36].mxu0 %v479_v36  ;;  %1785 = vmatmul.mubr.f32.gmra.mrb[36].mxu1 %v482_v39 }
  0xc7   : > { %719 = vmatprep.mubr.f32.mxu0 %v2116_v0  ;;  %1787 = vmatprep.mubr.f32.mxu1 %v483_v40 }
  0xca   : > { %720 = vmatmul.mubr.f32.gmra.mrb[38].mxu0 %v480_v37  ;;  %1788 = vmatmul.mubr.f32.gmra.mrb[38].mxu1 %v484_v41 }
  0xcb   : > { %725 = vmatprep.mubr.f32.mxu0 %v2116_v0  ;;  %1790 = vmatprep.mubr.f32.mxu1 %v2312_v55 }
  0xce   : > { %726 = vmatmul.mubr.f32.gmra.mrb[40].mxu0 %v481_v38  ;;  %1791 = vmatmul.mubr.f32.gmra.mrb[40].mxu1 %v2321_v60 }
  0xcf   : > { %731 = vmatprep.mubr.f32.mxu0 %v2116_v0  ;;  %1793 = vmatprep.mubr.f32.mxu1 %v2331_v2 }
  0xd2   : > { %732 = vmatmul.mubr.f32.gmra.mrb[42].mxu0 %v482_v39  ;;  %1794 = vmatmul.mubr.f32.gmra.mrb[42].mxu1 %v2339_v7  ;;  %v1326_v39 = vsub.s32 2, %v2414_v43 }
  0xd3   : > { %737 = vmatprep.mubr.f32.mxu0 %v2116_v0  ;;  %1796 = vmatprep.mubr.f32.mxu1 %v2346_v12 }
  0xd6   : > { %738 = vmatmul.mubr.f32.gmra.mrb[44].mxu0 %v483_v40  ;;  %1797 = vmatmul.mubr.f32.gmra.mrb[44].mxu1 %v2353_v17 }
  0xd7   : > { %743 = vmatprep.mubr.f32.mxu0 %v2116_v0  ;;  %1799 = vmatprep.mubr.f32.mxu1 %v2360_v22  ;;  %v2425_v0 = vrot.slane %v2420_v45, %v1318_v44 }
  0xda   : > { %744 = vmatmul.mubr.f32.gmra.mrb[46].mxu0 %v484_v41  ;;  %1800 = vmatmul.mubr.f32.gmra.mrb[46].mxu1 %v2367_v25 }
 0x151   : > { %v607_v48 = vpop.f32.mrb[0].mxu0  ;;  %v751_v49 = vpop.f32.mrb[0].mxu1 }
 0x152   : > { %v1331_v50 = vadd.f32 %v2425_v0, %v607_v48  ;;  %v1403_v51 = vadd.f32 %v2425_v0, %v751_v49  ;;  %v609_v52 = vpop.f32.mrb[1].mxu0  ;;  %v753_v53 = vpop.f32.mrb[1].mxu1 }
 0x153   : > { %v1332_v54 = vadd.f32 %v2428_v47, %v609_v52  ;;  %v1404_v55 = vadd.f32 %v2428_v47, %v753_v53 }
 0x154   : > { %1427 = vst [vmem:[%s2434_s9] sm:$0xff] %v1331_v50  ;;  %1499 = vst [vmem:[%s2434_s9 + $0x240] sm:$0xff] %v1403_v51  ;;  %v2492_v50 = vrot.slane %v2420_v45, %v1326_v39 }
 0x155   : > { %1428 = vst [vmem:[%s2434_s9 + $0x8] sm:$0xff] %v1332_v54  ;;  %1500 = vst [vmem:[%s2434_s9 + $0x248] sm:$0xff] %v1404_v55  ;;  %v613_v56 = vpop.f32.mrb[2].mxu0  ;;  %v757_v57 = vpop.f32.mrb[2].mxu1 }
 0x156   : > { %v1334_v58 = vadd.f32 %v2425_v0, %v613_v56  ;;  %v1406_v59 = vadd.f32 %v2425_v0, %v757_v57  ;;  %v615_v60 = vpop.f32.mrb[3].mxu0  ;;  %v759_v61 = vpop.f32.mrb[3].mxu1 }
 0x157   : > { %v1335_v62 = vadd.f32 %v2428_v47, %v615_v60  ;;  %v1407_v63 = vadd.f32 %v2428_v47, %v759_v61 }
 0x158   : > { %1430 = vst [vmem:[%s2434_s9 + $0x18] sm:$0xff] %v1334_v58  ;;  %1502 = vst [vmem:[%s2434_s9 + $0x258] sm:$0xff] %v1406_v59 }
 0x159   : > { %1431 = vst [vmem:[%s2434_s9 + $0x20] sm:$0xff] %v1335_v62  ;;  %1503 = vst [vmem:[%s2434_s9 + $0x260] sm:$0xff] %v1407_v63  ;;  %v619_v1 = vpop.f32.mrb[4].mxu0  ;;  %v763_v2 = vpop.f32.mrb[4].mxu1 }
 0x15a   : > { %v1337_v3 = vadd.f32 %v2425_v0, %v619_v1  ;;  %v1409_v4 = vadd.f32 %v2425_v0, %v763_v2  ;;  %v621_v5 = vpop.f32.mrb[5].mxu0  ;;  %v765_v6 = vpop.f32.mrb[5].mxu1 }
 0x15b   : > { %v1338_v7 = vadd.f32 %v2428_v47, %v621_v5  ;;  %v1410_v8 = vadd.f32 %v2428_v47, %v765_v6 }
 0x15c   : > { %1433 = vst [vmem:[%s2434_s9 + $0x30] sm:$0xff] %v1337_v3  ;;  %1505 = vst [vmem:[%s2434_s9 + $0x270] sm:$0xff] %v1409_v4 }
 0x15d   : > { %1434 = vst [vmem:[%s2434_s9 + $0x38] sm:$0xff] %v1338_v7  ;;  %1506 = vst [vmem:[%s2434_s9 + $0x278] sm:$0xff] %v1410_v8  ;;  %v625_v9 = vpop.f32.mrb[6].mxu0  ;;  %v769_v10 = vpop.f32.mrb[6].mxu1 }
 0x15e   : > { %v1340_v11 = vadd.f32 %v2425_v0, %v625_v9  ;;  %v1412_v12 = vadd.f32 %v2425_v0, %v769_v10  ;;  %v627_v13 = vpop.f32.mrb[7].mxu0  ;;  %v771_v14 = vpop.f32.mrb[7].mxu1 }
 0x15f   : > { %v1341_v15 = vadd.f32 %v2428_v47, %v627_v13  ;;  %v1413_v16 = vadd.f32 %v2428_v47, %v771_v14 }
 0x160   : > { %1436 = vst [vmem:[%s2434_s9 + $0x48] sm:$0xff] %v1340_v11  ;;  %1508 = vst [vmem:[%s2434_s9 + $0x288] sm:$0xff] %v1412_v12 }
 0x161   : > { %1437 = vst [vmem:[%s2434_s9 + $0x50] sm:$0xff] %v1341_v15  ;;  %1509 = vst [vmem:[%s2434_s9 + $0x290] sm:$0xff] %v1413_v16  ;;  %v631_v17 = vpop.f32.mrb[8].mxu0  ;;  %v775_v18 = vpop.f32.mrb[8].mxu1 }
 0x162   : > { %v1343_v19 = vadd.f32 %v2425_v0, %v631_v17  ;;  %v1415_v20 = vadd.f32 %v2425_v0, %v775_v18  ;;  %v633_v21 = vpop.f32.mrb[9].mxu0  ;;  %v777_v22 = vpop.f32.mrb[9].mxu1 }
 0x163   : > { %v1344_v23 = vadd.f32 %v2428_v47, %v633_v21  ;;  %v1416_v24 = vadd.f32 %v2428_v47, %v777_v22 }
 0x164   : > { %1439 = vst [vmem:[%s2434_s9 + $0x60] sm:$0xff] %v1343_v19  ;;  %1511 = vst [vmem:[%s2434_s9 + $0x2a0] sm:$0xff] %v1415_v20 }
 0x165   : > { %1440 = vst [vmem:[%s2434_s9 + $0x68] sm:$0xff] %v1344_v23  ;;  %1512 = vst [vmem:[%s2434_s9 + $0x2a8] sm:$0xff] %v1416_v24  ;;  %v637_v25 = vpop.f32.mrb[10].mxu0  ;;  %v781_v26 = vpop.f32.mrb[10].mxu1 }
 0x166   : > { %v1346_v27 = vadd.f32 %v2425_v0, %v637_v25  ;;  %v1418_v28 = vadd.f32 %v2425_v0, %v781_v26  ;;  %v639_v29 = vpop.f32.mrb[11].mxu0  ;;  %v783_v30 = vpop.f32.mrb[11].mxu1 }
 0x167   : > { %v1347_v31 = vadd.f32 %v2428_v47, %v639_v29  ;;  %v1419_v32 = vadd.f32 %v2428_v47, %v783_v30 }
 0x168   : > { %1442 = vst [vmem:[%s2434_s9 + $0x78] sm:$0xff] %v1346_v27  ;;  %1514 = vst [vmem:[%s2434_s9 + $0x2b8] sm:$0xff] %v1418_v28 }
 0x169   : > { %1443 = vst [vmem:[%s2434_s9 + $0x80] sm:$0xff] %v1347_v31  ;;  %1515 = vst [vmem:[%s2434_s9 + $0x2c0] sm:$0xff] %v1419_v32  ;;  %v643_v33 = vpop.f32.mrb[12].mxu0  ;;  %v787_v34 = vpop.f32.mrb[12].mxu1 }
 0x16a   : > { %v1349_v35 = vadd.f32 %v2425_v0, %v643_v33  ;;  %v1421_v36 = vadd.f32 %v2425_v0, %v787_v34  ;;  %v645_v37 = vpop.f32.mrb[13].mxu0  ;;  %v789_v38 = vpop.f32.mrb[13].mxu1 }
 0x16b   : > { %v1350_v40 = vadd.f32 %v2428_v47, %v645_v37  ;;  %v1422_v41 = vadd.f32 %v2428_v47, %v789_v38 }
 0x16c   : > { %1445 = vst [vmem:[%s2434_s9 + $0x90] sm:$0xff] %v1349_v35  ;;  %1517 = vst [vmem:[%s2434_s9 + $0x2d0] sm:$0xff] %v1421_v36 }
 0x16d   : > { %1446 = vst [vmem:[%s2434_s9 + $0x98] sm:$0xff] %v1350_v40  ;;  %1518 = vst [vmem:[%s2434_s9 + $0x2d8] sm:$0xff] %v1422_v41  ;;  %v649_v42 = vpop.f32.mrb[14].mxu0  ;;  %v793_v44 = vpop.f32.mrb[14].mxu1 }
 0x16e   : > { %v1352_v46 = vadd.f32 %v2425_v0, %v649_v42  ;;  %v1424_v48 = vadd.f32 %v2425_v0, %v793_v44  ;;  %v651_v49 = vpop.f32.mrb[15].mxu0  ;;  %v795_v43 = vpop.f32.mrb[15].mxu1 }
 0x16f   : > { %v1353_v51 = vadd.f32 %v2428_v47, %v651_v49  ;;  %v1425_v52 = vadd.f32 %v2428_v47, %v795_v43 }
 0x170   : > { %1448 = vst [vmem:[%s2434_s9 + $0xa8] sm:$0xff] %v1352_v46  ;;  %1520 = vst [vmem:[%s2434_s9 + $0x2e8] sm:$0xff] %v1424_v48 }
 0x171   : > { %1449 = vst [vmem:[%s2434_s9 + $0xb0] sm:$0xff] %v1353_v51  ;;  %1521 = vst [vmem:[%s2434_s9 + $0x2f0] sm:$0xff] %v1425_v52  ;;  %v655_v53 = vpop.f32.mrb[16].mxu0  ;;  %v1756_v54 = vpop.f32.mrb[16].mxu1 }
 0x172   : > { %v1355_v55 = vadd.f32 %v2425_v0, %v655_v53  ;;  %v1336_v56 = vadd.f32 %v1756_v54, %v2492_v50  ;;  %v657_v57 = vpop.f32.mrb[17].mxu0  ;;  %v864_v45 = vpop.f32.mrb[17].mxu1 }
 0x173   : > { %v1356_v58 = vadd.f32 %v2428_v47, %v657_v57  ;;  %v1333_v59 = vadd.f32 %v2492_v50, %v864_v45 }
 0x174   : > { %1451 = vst [vmem:[%s2434_s9 + $0xc0] sm:$0xff] %v1355_v55  ;;  %1432 = vst [vmem:[%s2434_s9 + $0x28] sm:$0xff] %v1336_v56 }
 0x175   : > { %1452 = vst [vmem:[%s2434_s9 + $0xc8] sm:$0xff] %v1356_v58  ;;  %1429 = vst [vmem:[%s2434_s9 + $0x10] sm:$0xff] %v1333_v59  ;;  %v661_v60 = vpop.f32.mrb[18].mxu0  ;;  %v1759_v61 = vpop.f32.mrb[18].mxu1 }
 0x176   : > { %v1358_v62 = vadd.f32 %v2425_v0, %v661_v60  ;;  %v1342_v63 = vadd.f32 %v1759_v61, %v2492_v50  ;;  %v663_v1 = vpop.f32.mrb[19].mxu0  ;;  %v874_v2 = vpop.f32.mrb[19].mxu1 }
 0x177   : > { %v1359_v3 = vadd.f32 %v2428_v47, %v663_v1  ;;  %v1339_v4 = vadd.f32 %v2492_v50, %v874_v2 }
 0x178   : > { %1454 = vst [vmem:[%s2434_s9 + $0xd8] sm:$0xff] %v1358_v62  ;;  %1438 = vst [vmem:[%s2434_s9 + $0x58] sm:$0xff] %v1342_v63 }
 0x179   : > { %1455 = vst [vmem:[%s2434_s9 + $0xe0] sm:$0xff] %v1359_v3  ;;  %1435 = vst [vmem:[%s2434_s9 + $0x40] sm:$0xff] %v1339_v4  ;;  %v667_v5 = vpop.f32.mrb[20].mxu0  ;;  %v1762_v6 = vpop.f32.mrb[20].mxu1 }
 0x17a   : > { %v1361_v7 = vadd.f32 %v2425_v0, %v667_v5  ;;  %v1348_v8 = vadd.f32 %v1762_v6, %v2492_v50  ;;  %v669_v9 = vpop.f32.mrb[21].mxu0  ;;  %v884_v10 = vpop.f32.mrb[21].mxu1 }
 0x17b   : > { %v1362_v11 = vadd.f32 %v2428_v47, %v669_v9  ;;  %v1345_v12 = vadd.f32 %v2492_v50, %v884_v10 }
 0x17c   : > { %1457 = vst [vmem:[%s2434_s9 + $0xf0] sm:$0xff] %v1361_v7  ;;  %1444 = vst [vmem:[%s2434_s9 + $0x88] sm:$0xff] %v1348_v8 }
 0x17d   : > { %1458 = vst [vmem:[%s2434_s9 + $0xf8] sm:$0xff] %v1362_v11  ;;  %1441 = vst [vmem:[%s2434_s9 + $0x70] sm:$0xff] %v1345_v12  ;;  %v673_v13 = vpop.f32.mrb[22].mxu0  ;;  %v1765_v14 = vpop.f32.mrb[22].mxu1 }
 0x17e   : > { %v1364_v15 = vadd.f32 %v2425_v0, %v673_v13  ;;  %v1354_v16 = vadd.f32 %v1765_v14, %v2492_v50  ;;  %v675_v17 = vpop.f32.mrb[23].mxu0  ;;  %v894_v18 = vpop.f32.mrb[23].mxu1 }
 0x17f   : > { %v1365_v19 = vadd.f32 %v2428_v47, %v675_v17  ;;  %v1351_v20 = vadd.f32 %v2492_v50, %v894_v18 }
 0x180   : > { %1460 = vst [vmem:[%s2434_s9 + $0x108] sm:$0xff] %v1364_v15  ;;  %1450 = vst [vmem:[%s2434_s9 + $0xb8] sm:$0xff] %v1354_v16 }
 0x181   : > { %1461 = vst [vmem:[%s2434_s9 + $0x110] sm:$0xff] %v1365_v19  ;;  %1447 = vst [vmem:[%s2434_s9 + $0xa0] sm:$0xff] %v1351_v20  ;;  %v679_v21 = vpop.f32.mrb[24].mxu0  ;;  %v1768_v22 = vpop.f32.mrb[24].mxu1 }
 0x182   : > { %v1367_v23 = vadd.f32 %v2425_v0, %v679_v21  ;;  %v1360_v24 = vadd.f32 %v1768_v22, %v2492_v50  ;;  %v681_v25 = vpop.f32.mrb[25].mxu0  ;;  %v904_v26 = vpop.f32.mrb[25].mxu1 }
 0x183   : > { %v1368_v27 = vadd.f32 %v2428_v47, %v681_v25  ;;  %v1357_v28 = vadd.f32 %v2492_v50, %v904_v26 }
 0x184   : > { %1463 = vst [vmem:[%s2434_s9 + $0x120] sm:$0xff] %v1367_v23  ;;  %1456 = vst [vmem:[%s2434_s9 + $0xe8] sm:$0xff] %v1360_v24 }
 0x185   : > { %1464 = vst [vmem:[%s2434_s9 + $0x128] sm:$0xff] %v1368_v27  ;;  %1453 = vst [vmem:[%s2434_s9 + $0xd0] sm:$0xff] %v1357_v28  ;;  %v685_v29 = vpop.f32.mrb[26].mxu0  ;;  %v1771_v30 = vpop.f32.mrb[26].mxu1 }
 0x186   : > { %v1370_v31 = vadd.f32 %v2425_v0, %v685_v29  ;;  %v1366_v32 = vadd.f32 %v1771_v30, %v2492_v50  ;;  %v687_v33 = vpop.f32.mrb[27].mxu0  ;;  %v914_v34 = vpop.f32.mrb[27].mxu1 }
 0x187   : > { %v1371_v35 = vadd.f32 %v2428_v47, %v687_v33  ;;  %v1363_v36 = vadd.f32 %v2492_v50, %v914_v34 }
 0x188   : > { %1466 = vst [vmem:[%s2434_s9 + $0x138] sm:$0xff] %v1370_v31  ;;  %1462 = vst [vmem:[%s2434_s9 + $0x118] sm:$0xff] %v1366_v32 }
 0x189   : > { %1467 = vst [vmem:[%s2434_s9 + $0x140] sm:$0xff] %v1371_v35  ;;  %1459 = vst [vmem:[%s2434_s9 + $0x100] sm:$0xff] %v1363_v36  ;;  %v691_v37 = vpop.f32.mrb[28].mxu0  ;;  %v1774_v38 = vpop.f32.mrb[28].mxu1 }
 0x18a   : > { %v1373_v39 = vadd.f32 %v2425_v0, %v691_v37  ;;  %v1372_v40 = vadd.f32 %v1774_v38, %v2492_v50  ;;  %v693_v41 = vpop.f32.mrb[29].mxu0  ;;  %v924_v42 = vpop.f32.mrb[29].mxu1 }
 0x18b   : > { %v1374_v44 = vadd.f32 %v2428_v47, %v693_v41  ;;  %v1369_v46 = vadd.f32 %v2492_v50, %v924_v42 }
 0x18c   : > { %1469 = vst [vmem:[%s2434_s9 + $0x150] sm:$0xff] %v1373_v39  ;;  %1468 = vst [vmem:[%s2434_s9 + $0x148] sm:$0xff] %v1372_v40 }
 0x18d   : > { %1470 = vst [vmem:[%s2434_s9 + $0x158] sm:$0xff] %v1374_v44  ;;  %1465 = vst [vmem:[%s2434_s9 + $0x130] sm:$0xff] %v1369_v46  ;;  %v697_v48 = vpop.f32.mrb[30].mxu0  ;;  %v1777_v49 = vpop.f32.mrb[30].mxu1 }
 0x18e   : > { %v1376_v43 = vadd.f32 %v2425_v0, %v697_v48  ;;  %v1378_v51 = vadd.f32 %v1777_v49, %v2492_v50  ;;  %v699_v52 = vpop.f32.mrb[31].mxu0  ;;  %v934_v53 = vpop.f32.mrb[31].mxu1 }
 0x18f   : > { %v1377_v54 = vadd.f32 %v2428_v47, %v699_v52  ;;  %v1375_v55 = vadd.f32 %v2492_v50, %v934_v53 }
 0x190   : > { %1472 = vst [vmem:[%s2434_s9 + $0x168] sm:$0xff] %v1376_v43  ;;  %1474 = vst [vmem:[%s2434_s9 + $0x178] sm:$0xff] %v1378_v51 }
 0x191   : > { %1473 = vst [vmem:[%s2434_s9 + $0x170] sm:$0xff] %v1377_v54  ;;  %1471 = vst [vmem:[%s2434_s9 + $0x160] sm:$0xff] %v1375_v55  ;;  %v703_v56 = vpop.f32.mrb[32].mxu0  ;;  %v1780_v57 = vpop.f32.mrb[32].mxu1 }
 0x192   : > { %v1379_v45 = vadd.f32 %v2425_v0, %v703_v56  ;;  %v1384_v58 = vadd.f32 %v1780_v57, %v2492_v50  ;;  %v705_v59 = vpop.f32.mrb[33].mxu0  ;;  %v944_v60 = vpop.f32.mrb[33].mxu1 }
 0x193   : > { %v1380_v61 = vadd.f32 %v2428_v47, %v705_v59  ;;  %v1381_v62 = vadd.f32 %v2492_v50, %v944_v60 }
 0x194   : > { %1475 = vst [vmem:[%s2434_s9 + $0x180] sm:$0xff] %v1379_v45  ;;  %1480 = vst [vmem:[%s2434_s9 + $0x1a8] sm:$0xff] %v1384_v58 }
 0x195   : > { %1476 = vst [vmem:[%s2434_s9 + $0x188] sm:$0xff] %v1380_v61  ;;  %1477 = vst [vmem:[%s2434_s9 + $0x190] sm:$0xff] %v1381_v62  ;;  %v709_v63 = vpop.f32.mrb[34].mxu0  ;;  %v1783_v1 = vpop.f32.mrb[34].mxu1 }
 0x196   : > { %v1382_v2 = vadd.f32 %v2425_v0, %v709_v63  ;;  %v1390_v3 = vadd.f32 %v1783_v1, %v2492_v50  ;;  %v711_v4 = vpop.f32.mrb[35].mxu0  ;;  %v954_v5 = vpop.f32.mrb[35].mxu1 }
 0x197   : > { %v1383_v6 = vadd.f32 %v2428_v47, %v711_v4  ;;  %v1387_v7 = vadd.f32 %v2492_v50, %v954_v5 }
 0x198   : > { %1478 = vst [vmem:[%s2434_s9 + $0x198] sm:$0xff] %v1382_v2  ;;  %1486 = vst [vmem:[%s2434_s9 + $0x1d8] sm:$0xff] %v1390_v3 }
 0x199   : > { %1479 = vst [vmem:[%s2434_s9 + $0x1a0] sm:$0xff] %v1383_v6  ;;  %1483 = vst [vmem:[%s2434_s9 + $0x1c0] sm:$0xff] %v1387_v7  ;;  %v715_v8 = vpop.f32.mrb[36].mxu0  ;;  %v1786_v9 = vpop.f32.mrb[36].mxu1 }
 0x19a   : > { %v1385_v10 = vadd.f32 %v2425_v0, %v715_v8  ;;  %v1396_v11 = vadd.f32 %v1786_v9, %v2492_v50  ;;  %v717_v12 = vpop.f32.mrb[37].mxu0  ;;  %v964_v13 = vpop.f32.mrb[37].mxu1 }
 0x19b   : > { %v1386_v14 = vadd.f32 %v2428_v47, %v717_v12  ;;  %v1393_v15 = vadd.f32 %v2492_v50, %v964_v13 }
 0x19c   : > { %1481 = vst [vmem:[%s2434_s9 + $0x1b0] sm:$0xff] %v1385_v10  ;;  %1492 = vst [vmem:[%s2434_s9 + $0x208] sm:$0xff] %v1396_v11 }
 0x19d   : > { %1482 = vst [vmem:[%s2434_s9 + $0x1b8] sm:$0xff] %v1386_v14  ;;  %1489 = vst [vmem:[%s2434_s9 + $0x1f0] sm:$0xff] %v1393_v15  ;;  %v721_v16 = vpop.f32.mrb[38].mxu0  ;;  %v1789_v17 = vpop.f32.mrb[38].mxu1 }
 0x19e   : > { %v1388_v18 = vadd.f32 %v2425_v0, %v721_v16  ;;  %v1402_v19 = vadd.f32 %v1789_v17, %v2492_v50  ;;  %v723_v20 = vpop.f32.mrb[39].mxu0  ;;  %v974_v21 = vpop.f32.mrb[39].mxu1 }
 0x19f   : > { %v1389_v22 = vadd.f32 %v2428_v47, %v723_v20  ;;  %v1399_v23 = vadd.f32 %v2492_v50, %v974_v21 }
 0x1a0   : > { %1484 = vst [vmem:[%s2434_s9 + $0x1c8] sm:$0xff] %v1388_v18  ;;  %1498 = vst [vmem:[%s2434_s9 + $0x238] sm:$0xff] %v1402_v19 }
 0x1a1   : > { %1485 = vst [vmem:[%s2434_s9 + $0x1d0] sm:$0xff] %v1389_v22  ;;  %1495 = vst [vmem:[%s2434_s9 + $0x220] sm:$0xff] %v1399_v23  ;;  %v727_v24 = vpop.f32.mrb[40].mxu0  ;;  %v1792_v25 = vpop.f32.mrb[40].mxu1 }
 0x1a2   : > { %v1391_v26 = vadd.f32 %v2425_v0, %v727_v24  ;;  %v1408_v27 = vadd.f32 %v1792_v25, %v2492_v50  ;;  %v729_v28 = vpop.f32.mrb[41].mxu0  ;;  %v984_v29 = vpop.f32.mrb[41].mxu1 }
 0x1a3   : > { %v1392_v30 = vadd.f32 %v2428_v47, %v729_v28  ;;  %v1405_v31 = vadd.f32 %v2492_v50, %v984_v29 }
 0x1a4   : > { %1487 = vst [vmem:[%s2434_s9 + $0x1e0] sm:$0xff] %v1391_v26  ;;  %1504 = vst [vmem:[%s2434_s9 + $0x268] sm:$0xff] %v1408_v27 }
 0x1a5   : > { %1488 = vst [vmem:[%s2434_s9 + $0x1e8] sm:$0xff] %v1392_v30  ;;  %1501 = vst [vmem:[%s2434_s9 + $0x250] sm:$0xff] %v1405_v31  ;;  %v733_v32 = vpop.f32.mrb[42].mxu0  ;;  %v1795_v33 = vpop.f32.mrb[42].mxu1 }
 0x1a6   : > { %v1394_v34 = vadd.f32 %v2425_v0, %v733_v32  ;;  %v1414_v35 = vadd.f32 %v1795_v33, %v2492_v50  ;;  %v735_v36 = vpop.f32.mrb[43].mxu0  ;;  %v994_v37 = vpop.f32.mrb[43].mxu1 }
 0x1a7   : > { %v1395_v38 = vadd.f32 %v2428_v47, %v735_v36  ;;  %v1411_v39 = vadd.f32 %v2492_v50, %v994_v37 }
 0x1a8   : > { %1490 = vst [vmem:[%s2434_s9 + $0x1f8] sm:$0xff] %v1394_v34  ;;  %1510 = vst [vmem:[%s2434_s9 + $0x298] sm:$0xff] %v1414_v35 }
 0x1a9   : > { %1491 = vst [vmem:[%s2434_s9 + $0x200] sm:$0xff] %v1395_v38  ;;  %1507 = vst [vmem:[%s2434_s9 + $0x280] sm:$0xff] %v1411_v39  ;;  %v739_v40 = vpop.f32.mrb[44].mxu0  ;;  %v1798_v41 = vpop.f32.mrb[44].mxu1 }
 0x1aa   : > { %v1397_v42 = vadd.f32 %v2425_v0, %v739_v40  ;;  %v1420_v44 = vadd.f32 %v1798_v41, %v2492_v50  ;;  %v741_v46 = vpop.f32.mrb[45].mxu0  ;;  %v1004_v48 = vpop.f32.mrb[45].mxu1 }
 0x1ab   : > { %v1398_v49 = vadd.f32 %v2428_v47, %v741_v46  ;;  %v1417_v43 = vadd.f32 %v2492_v50, %v1004_v48 }
 0x1ac   : > { %1493 = vst [vmem:[%s2434_s9 + $0x210] sm:$0xff] %v1397_v42  ;;  %1516 = vst [vmem:[%s2434_s9 + $0x2c8] sm:$0xff] %v1420_v44 }
 0x1ad   : > { %1494 = vst [vmem:[%s2434_s9 + $0x218] sm:$0xff] %v1398_v49  ;;  %1513 = vst [vmem:[%s2434_s9 + $0x2b0] sm:$0xff] %v1417_v43  ;;  %v745_v51 = vpop.f32.mrb[46].mxu0  ;;  %v1801_v52 = vpop.f32.mrb[46].mxu1 }
 0x1ae   : > { %v1400_v53 = vadd.f32 %v2425_v0, %v745_v51  ;;  %v1426_v54 = vadd.f32 %v1801_v52, %v2492_v50  ;;  %v747_v55 = vpop.f32.mrb[47].mxu0  ;;  %v1014_v56 = vpop.f32.mrb[47].mxu1 }
 0x1af   : > { %v1401_v57 = vadd.f32 %v2428_v47, %v747_v55  ;;  %v1423_v45 = vadd.f32 %v2492_v50, %v1014_v56 }
 0x1b0   : > { %1496 = vst [vmem:[%s2434_s9 + $0x228] sm:$0xff] %v1400_v53  ;;  %1522 = vst [vmem:[%s2434_s9 + $0x2f8] sm:$0xff] %v1426_v54 }
 0x1b1   : > { %1497 = vst [vmem:[%s2434_s9 + $0x230] sm:$0xff] %v1401_v57  ;;  %1519 = vst [vmem:[%s2434_s9 + $0x2e0] sm:$0xff] %v1423_v45 }
 0x1b2   : > { %2035 = shalt.err (!%p2032_p5)
}
 0x1b3   : > { %s2036_s29 = scalar_lea.hbm %s2627_s26, 12288  ;;  %s2040_s20 = scalar_lea.hbm %s2687_s3, 24576 }
 0x1b4   : > { %p2037_p9 = scmp.ne.s32.totalorder %s2627_s26, %s2036_s29  ;;  %p2041_p3 = scmp.lt.u32.totalorder %s2627_s26, %s2687_s3 }
 0x1b5   : > { %p2042_p7 = scmp.lt.u32.totalorder %s2040_s20, %s2036_s29  ;;  %p2044_p4 = scmp.lt.u32.totalorder %s2036_s29, %s2627_s26 }
 0x1b6   : > { %p2038_p1 = pnand %p2037_p9, %p2236_p10 }
 0x1b7   : > { %p2043_p13 = por %p2042_p7, %p2041_p3 }
 0x1b8   : > { %p2039_p2 = pneg %p2038_p1 }
 0x1b9   : > { %p2045_p6 = por %p2044_p4, %p2043_p13 }
 0x1bb   : > { %p2046_p8 = pnand %p2045_p6, %p2039_p2 }
 0x1bd   : > { %2049 = shalt.err (!%p2046_p8)
}
 0x1be   : > { %s2118_s9 = smov 384   ;;  %s2119_s10 = smov 24  }
 0x1bf   : > { %1890 = dma.vmem_to_hbm [thread:$0]  (%p2236_p10), %s2629_s11, 12288, %s2627_s26, %s1524_s7, %s2118_s9, %s2118_s9, %s2119_s10  }
 0x1c0 PF: > { %s1555_s15 = sand.u32 1, %s2088_s12   ;;  %p2705_p12 = scmp.ne.s32.totalorder %s2695_s23, 0 }
 0x1c1   : > { %p2706_p11 = scmp.ge.s32.totalorder %s2108_s17, 2  ;;  %s1556_s18 = scalar_lea.sflag [#allocation5], %s1555_s15 }
 0x1c3   : > { %p1901_p0 = pnand %p2706_p11, %p2705_p12 }
 0x1c5   : > { %2083 = dma.done.wait (!%p1901_p0), %s1556_s18, 12288  }
 0x1c6   : > { %2085 = vsyncadd (!%p1901_p0), %s1556_s18, 4294955008  ;;  %s20_s17 = sadd.s32 1, %s2108_s17   ;;  %s2707_s12 = smov %s2092_s13 }
 0x1c7   : > { %p17_p5 = scmp.ge.s32.totalorder %s20_s17, 4   ;;  %s2708_s13 = smov %s2096_s14 }
 0x1c8   : > { %s2709_s14 = smov %s2245_s5  ;;  %s2710_s15 = smov %s2104_s16 }
 0x1c9   : > { %s2711_s16 = smov %s2713_s28  ;;  %19 = sbr.rel (!%p17_p5) target bundleno = 7 (0x7), region = 93 }
 0x1d0   :  { %1561 = vsyncpa [#allocation4], 1 }
 0x1d1   :  { %1563 = vsyncpa [#allocation4 + $0x1], 1 }
 0x1d2   :  { %1564 = vsyncpa [#allocation7], 1 }
 0x1d3   :  { %1565 = vsyncpa [#allocation5], 1 }
 0x1d4   :  { %1567 = vsyncpa [#allocation5 + $0x1], 1 }

</bundles_post_ra>
